<compile_context>
chip_gen: v6e
topology: v6e:2x2x1
jax: 0.10.0
libtpu: 0.0.40
codegen_flags: <defaults>
</compile_context>

<pallas_src>
import jax
import jax.numpy as jnp
from jax.experimental import pallas as pl
from jax.experimental.pallas import tpu as pltpu


def _feature_dropout_kernel(mask_ref, x_ref, o_ref):
    """o = x * mask.

    mask_ref : VMEM (r_block, 1)      -- 0/1 keep mask; lane-broadcast on the VPU
    x_ref    : VMEM (r_block, tile_n)
    o_ref    : VMEM (r_block, tile_n)
    """
    o_ref[...] = x_ref[...] * mask_ref[...]


def _vmem_budgets():
    """Return (per-x-tile byte budget, scoped vmem_limit_bytes), generation-aware.

    Double-buffered in + out tiles are ~4x one x tile, so the budgets below keep
    total resident VMEM comfortably under the scoped limit on every generation.
    """
    try:
        cap = pltpu.get_tpu_info().vmem_capacity_bytes
    except Exception:
        cap = 64 * 1024 * 1024                  # unknown: assume v7x-sized VMEM
    if cap >= 128 * 1024 * 1024:                # v5e / v6e: 128 MiB physical
        return 12 * 1024 * 1024, 64 * 1024 * 1024
    return 6 * 1024 * 1024, 32 * 1024 * 1024    # v7x: 64 MiB per TensorCore


def _choose_tiles(R, N, itemsize, budget_bytes):
    """Pick (r_block, tile_n) so one x tile is ~budget_bytes and lane-dense.

    Each block dim is either a multiple of the (8, 128) tile unit or spans the
    full axis; tail blocks are padded (grid uses cdiv), so nothing here forces
    the tile to divide the axis extent.
    """
    # Whole array fits in a single block.
    if R * N * itemsize <= budget_bytes:
        return R, N
    # Keep every row resident and tile only the lane (N) axis.
    tile_n = (budget_bytes // (R * itemsize)) // 128 * 128
    if tile_n >= 128:
        if tile_n >= N:
            return R, N
        return R, int(tile_n)
    # R is too large for even a 128-wide stripe: tile rows as well.
    tile_n = 128 if N > 128 else N
    r_block = (budget_bytes // (tile_n * itemsize)) // 8 * 8
    r_block = int(max(8, min(r_block, R)))
    if r_block != R:
        r_block = max(8, r_block // 8 * 8)      # multiple of 8 when < R
    return r_block, tile_n


def _feature_dropout_pallas(x, keep_mask, *, block_budget_bytes=None):
    """Apply a precomputed (B, C) keep mask to x of shape (B, C, N)."""
    B, C, N = x.shape
    R = B * C
    itemsize = jnp.dtype(x.dtype).itemsize

    budget, vmem_limit = _vmem_budgets()
    if block_budget_bytes is not None:          # test hook: force small tiles
        budget = block_budget_bytes
    r_block, tile_n = _choose_tiles(R, N, itemsize, budget)
    grid = (pl.cdiv(R, r_block), pl.cdiv(N, tile_n))

    x2 = x.reshape(R, N)                               # free relayout in HBM
    mask2 = keep_mask.astype(x.dtype).reshape(R, 1)    # explicit size-1 lane axis

    out = pl.pallas_call(
        _feature_dropout_kernel,
        out_shape=jax.ShapeDtypeStruct((R, N), x.dtype),
        grid=grid,
        in_specs=[
            pl.BlockSpec((r_block, 1), lambda r, n: (r, 0)),        # mask column
            pl.BlockSpec((r_block, tile_n), lambda r, n: (r, n)),   # x tile
        ],
        out_specs=pl.BlockSpec((r_block, tile_n), lambda r, n: (r, n)),
        compiler_params=pltpu.CompilerParams(
            dimension_semantics=("parallel", "parallel"),
            vmem_limit_bytes=vmem_limit,
        ),
        cost_estimate=pl.CostEstimate(
            flops=R * N,
            transcendentals=0,
            bytes_accessed=2 * R * N * itemsize + R * itemsize,
        ),
    )(mask2, x2)
    return out.reshape(B, C, N)


def random_dropout(x, key, p=0.5, training=True):
    """JAX/Pallas equivalent of RandomDropout.forward.

    x        : (B, C, N) array (batch, channels, points)
    key      : jax PRNG key (samples theta and the per-channel keep mask)
    p        : upper bound of the uniform distribution theta is drawn from
    training : Python bool (must be static; a traced flag is not supported).
               If False, identity (feature_dropout_no_scaling eval behavior).
    """
    if not training:
        return x

    B, C, _ = x.shape
    k_theta, k_mask = jax.random.split(key)
    theta = jax.random.uniform(k_theta, (), dtype=jnp.float32,
                               minval=0.0, maxval=p)
    u = jax.random.uniform(k_mask, (B, C), dtype=jnp.float32)
    keep_mask = (u >= theta).astype(x.dtype)    # keep w.p. 1 - theta, no rescale
    return _feature_dropout_pallas(x, keep_mask)


if __name__ == "__main__":
    key = jax.random.PRNGKey(0)
    k_x, k_drop, k_x2, k_x3 = jax.random.split(key, 4)

    # --- small shape consistent with the module's NC* convention -------------
    B, C, N = 2, 4, 16
    x = jax.random.normal(k_x, (B, C, N), dtype=jnp.float32)

    y = jax.block_until_ready(random_dropout(x, k_drop, p=0.5, training=True))

    xr = jax.device_get(x)
    yr = jax.device_get(y)
    for b in range(B):
        for c in range(C):
            ch = yr[b, c]
            assert (abs(ch).sum() == 0.0) or (ch == xr[b, c]).all(), \
                "channel neither fully dropped nor identical"

    # Eval mode is identity.
    y_eval = jax.block_until_ready(random_dropout(x, k_drop, p=0.5, training=False))
    assert (jax.device_get(y_eval) == xr).all()

    # --- tiled grid along N with a padded tail block (N not multiple of 128) -
    B2, C2, N2 = 2, 8, 2000
    x2 = jax.random.normal(k_x2, (B2, C2, N2), dtype=jnp.float32)
    mask2 = (jnp.arange(B2 * C2, dtype=jnp.int32).reshape(B2, C2) % 2
             ).astype(jnp.float32)                       # alternating keep/drop
    y2 = jax.block_until_ready(
        _feature_dropout_pallas(x2, mask2, block_budget_bytes=16 * 1024))
    ref2 = x2 * mask2[:, :, None]
    assert jnp.allclose(y2, ref2), "tiled-N kernel mismatch vs reference"

    # --- row tiling with a padded row tail (B*C not multiple of 8) -----------
    B3, C3, N3 = 3, 5, 384
    x3 = jax.random.normal(k_x3, (B3, C3, N3), dtype=jnp.float32)
    mask3 = ((jnp.arange(B3 * C3, dtype=jnp.int32).reshape(B3, C3) % 3) != 0
             ).astype(jnp.float32)
    y3 = jax.block_until_ready(
        _feature_dropout_pallas(x3, mask3, block_budget_bytes=2 * 1024))
    ref3 = x3 * mask3[:, :, None]
    assert jnp.allclose(y3, ref3), "tiled-rows kernel mismatch vs reference"

    print("KERNEL_OK")
</pallas_src>

<mosaic_0001>
module attributes {stable_mosaic.version = 11 : i64} {
  func.func @_feature_dropout_kernel(%arg0: i32, %arg1: i32, %arg2: memref<8x1xf32, #tpu.memory_space<vmem>>, %arg3: memref<8x16xf32, #tpu.memory_space<vmem>>, %arg4: memref<8x16xf32, #tpu.memory_space<vmem>>) attributes {dimension_semantics = [#tpu.dimension_semantics<parallel>, #tpu.dimension_semantics<parallel>], iteration_bounds = array<i64: 1, 1>, scalar_prefetch = 0 : i64, scratch_operands = 0 : i64, tpu.core_type = #tpu.core_type<tc>, window_params = [{transform_indices = @transform_0, window_bounds = array<i64: 8, 1>}, {transform_indices = @transform_1, window_bounds = array<i64: 8, 16>}, {transform_indices = @transform_2, window_bounds = array<i64: 8, 16>}]} {
    %c0 = arith.constant 0 : index
    %c0_0 = arith.constant 0 : index
    %0 = vector.load %arg3[%c0, %c0_0] : memref<8x16xf32, #tpu.memory_space<vmem>>, vector<8x16xf32>
    %c0_1 = arith.constant 0 : index
    %c0_2 = arith.constant 0 : index
    %1 = vector.load %arg2[%c0_1, %c0_2] : memref<8x1xf32, #tpu.memory_space<vmem>>, vector<8x1xf32>
    %2 = vector.broadcast %1 : vector<8x1xf32> to vector<8x16xf32>
    %3 = arith.mulf %0, %2 : vector<8x16xf32>
    %c0_3 = arith.constant 0 : index
    %c0_4 = arith.constant 0 : index
    %4 = vector.load %arg4[%c0_3, %c0_4] : memref<8x16xf32, #tpu.memory_space<vmem>>, vector<8x16xf32>
    tpu.vector_store %arg4[%c0_3, %c0_4], %3 {strides = array<i32>} : memref<8x16xf32, #tpu.memory_space<vmem>>, vector<8x16xf32>,
    return
  }
  func.func @transform_0(%arg0: i32, %arg1: i32) -> (i32, i32) {
    %c0_i32 = arith.constant 0 : i32
    %c0_i32_0 = arith.constant 0 : i32
    return %arg0, %c0_i32 : i32, i32
  }
  func.func @transform_1(%arg0: i32, %arg1: i32) -> (i32, i32) {
    %c0_i32 = arith.constant 0 : i32
    return %arg0, %arg1 : i32, i32
  }
  func.func @transform_2(%arg0: i32, %arg1: i32) -> (i32, i32) {
    %c0_i32 = arith.constant 0 : i32
    return %arg0, %arg1 : i32, i32
  }
}

</mosaic_0001>

<bundles_post_ra>
// kernel: tpu_custom_call.1
= control target key start
LH: loop header
LB: loop body
LE: loop exit
PB: predicated region body
PF: predicated region fallthrough
CT: control target
= control target key end

     0   :  { %s87_s0 = inlined_call_operand.vmem [shape: f32[8,1], index: 0, kind: input, shape index: {}]   ;;  %s88_s1 = inlined_call_operand.vmem [shape: f32[8,16], index: 1, kind: input, shape index: {}]   ;;  %s89_s2 = inlined_call_operand.hbm [shape: f32[8,16], index: 2, kind: output, shape index: {}]  }
   0x1   :  { %v13_v0 = vld [vmem:[%s87_s0] sm:$0xff] }
   0x2   :  { %7 = vsyncpa [#allocation3], 0  ;;  %v61_v1 = vmov 0   ;;  %v12_v2 = vld [vmem:[%s88_s1] sm:$0xff]  ;;  %s62_s13 = smov [#allocation2]   ;;  %vm20_vm0 = vcmask 130048  }
   0x3   :  { %38 = vset.pattern.permute.xlu0 %v61_v1  ;;  %s28_s14 = sshll.u32 %s62_s13, 4  ;;  %s29_s14 = int_to_ptr.vmem [resolvable:$true] %s28_s14 }
   0x4   :  { %16 = vperm.xlu0 %38, %v13_v0   ;;  %s39_s15 = scalar_lea.vmem %s29_s14, 128  ;;  %p44_p1 = scmp.lt.s32.totalorder %s29_s14, %s29_s14 }
   0x5   :  { %p40_p0 = scmp.ne.s32.totalorder %s29_s14, %s39_s15  ;;  %p45_p2 = scmp.lt.s32.totalorder %s39_s15, %s39_s15 }
   0x7   :  { %p46_p3 = por %p45_p2, %p44_p1 }
   0x9   :  { %p47_p4 = pnand %p46_p3, %p40_p0 }
  0x7f   :  { %v17_v3 = vpop.permute.xlu0 %16 }
  0x80   :  { %v19_v4 = vmul.f32 %v17_v3, %v12_v2 }
  0x82   :  { %21 = vst.msk [vmem:[#allocation2] sm:$0xff] %vm20_vm0, %v19_v4 }
  0x83   :  { %50 = shalt.err (!%p47_p4)
}
  0x84   :  { %31 = dma.vmem_to_hbm [thread:$0]  %s29_s14, 128, %s89_s2, [#allocation3]  }
  0x85   :  { %59 = dma.done.wait [#allocation3], 128  }
  0x86   :  { %60 = vsyncadd [#allocation3], 4294967168 }
  0x87   :  { %35 = vsyncpa [#allocation3], 1 }

</bundles_post_ra>
